<compile_context>
chip_gen: v5e
topology: v5e:2x2
jax: 0.10.0
libtpu: 0.0.40
codegen_flags: <defaults>
</compile_context>

<pallas_src>
import functools

import jax
import jax.numpy as jnp
from jax import lax
from jax.experimental import pallas as pl
from jax.experimental.pallas import tpu as pltpu

_NEG_BIG = -1e30  # finite mask sentinel (avoids -inf - -inf = NaN on fully-masked tiles)


def _round_up(x, m):
    return ((x + m - 1) // m) * m


def _vmem_capacity_bytes():
    """Best-effort physical VMEM query; conservative 64 MiB fallback."""
    try:
        info = pltpu.get_tpu_info()
        for attr in ("vmem_capacity_bytes", "vmem_size_bytes", "vmem_bytes"):
            v = getattr(info, attr, None)
            if v:
                return int(v)
    except Exception:
        pass
    return 64 * 1024 * 1024


def _nce_kernel(lhs_ref, rhs_ref, idr_ref, idc_ref, out_ref,
                m_sc, l_sc, d_sc, *, inv_t, n_valid, tr, tc):
    ri = pl.program_id(0)
    ci = pl.program_id(1)

    @pl.when(ci == 0)
    def _():
        m_sc[...] = jnp.full_like(m_sc, _NEG_BIG)
        l_sc[...] = jnp.zeros_like(l_sc)
        d_sc[...] = jnp.zeros_like(d_sc)

    # (tr, tc) logits tile on the MXU, native dtype in, f32 accumulation out.
    logits = lax.dot_general(
        lhs_ref[...], rhs_ref[...],
        dimension_numbers=(((1,), (1,)), ((), ())),
        preferred_element_type=jnp.float32) * jnp.float32(inv_t)

    # Tiny global-index vectors (no full-tile iota builds).
    rg = ri * tr + lax.broadcasted_iota(jnp.int32, (tr, 1), 0)   # (tr, 1)
    cg = ci * tc + lax.broadcasted_iota(jnp.int32, (1, tc), 1)   # (1, tc)

    same_id = idr_ref[...] == idc_ref[...]                       # (tr, tc) broadcast compare
    off_diag = rg != cg                                          # (tr, tc) broadcast compare
    col_pad = cg >= n_valid                                      # (1, tc)
    mask = (same_id & off_diag) | col_pad                        # (tr, tc)
    logits_m = jnp.where(mask, jnp.float32(_NEG_BIG), logits)

    # Correct-class logit per row = global diagonal (never masked); harvest it from the tile(s)
    # that intersect this row block's diagonal range instead of recomputing a row-wise dot.
    row0 = ri * tr
    col0 = ci * tc

    @pl.when((row0 < col0 + tc) & (row0 + tr > col0))
    def _():
        d_sc[...] += jnp.sum(jnp.where(rg == cg, logits, jnp.float32(0.0)),
                             axis=-1, keepdims=True)

    # Online (flash-style) log-sum-exp over the column tiles.
    m_prev = m_sc[...]
    m_new = jnp.maximum(m_prev, jnp.max(logits_m, axis=-1, keepdims=True))
    # The where(mask, 0, ...) is load-bearing: a fully-masked tile would otherwise contribute
    # exp(0)=1 per masked entry when m_new == m_prev == -1e30.
    p = jnp.where(mask, jnp.float32(0.0), jnp.exp(logits_m - m_new))
    l_sc[...] = l_sc[...] * jnp.exp(m_prev - m_new) + jnp.sum(p, axis=-1, keepdims=True)
    m_sc[...] = m_new

    @pl.when(ci == pl.num_programs(1) - 1)
    def _():
        lse = m_sc[...] + jnp.log(l_sc[...])
        out_ref[...] = lse - d_sc[...]          # per-row cross-entropy (logits pre-scaled)


def nce_loss(batch_sample_one, batch_sample_two, intent_ids=None, *,
             temperature=1.0, matmul_dtype=None):
    """Pallas TPU implementation of NCELoss.forward (returns the scalar mean CE loss)."""
    x1 = batch_sample_one
    x2 = batch_sample_two
    if matmul_dtype is not None:
        x1 = x1.astype(matmul_dtype)
        x2 = x2.astype(matmul_dtype)
    B, D = x1.shape
    N = 2 * B

    if intent_ids is None:
        # arange ids make the unified mask collapse to "mask only the sim11/sim22 diagonals",
        # i.e. exactly the torch `intent_ids is None` branch.
        ids = jnp.arange(B, dtype=jnp.int32)
    else:
        ids = intent_ids.reshape(-1).astype(jnp.int32)
    ids2 = jnp.concatenate([ids, ids])       # ids of both logits rows and logits cols

    itemsize = jnp.dtype(x1.dtype).itemsize
    sub = {4: 8, 2: 16, 1: 32}.get(itemsize, 8)      # dtype sublane tile
    Dp = _round_up(D, 128)

    # ---- tile selection / VMEM budgeting --------------------------------------------------
    cap = _vmem_capacity_bytes()
    budget = max(cap - 24 * 1024 * 1024, 12 * 1024 * 1024)
    tr_cap = 512 if cap >= 100 * 1024 * 1024 else 256    # 128-MiB chips vs 64-MiB (v7x)

    if N <= sub:
        TR = _round_up(N, sub)
    else:
        # at least two row blocks so the "parallel" axis feeds both TensorCores
        TR = min(tr_cap, _round_up(N, sub), _round_up((N + 1) // 2, sub))
    TC = min(1024, _round_up(N, 128))

    def vmem_est(tr, tc):
        dbl = 2                                              # double-buffered blocks
        in_b = dbl * (tr + tc) * Dp * itemsize               # lhs + rhs blocks
        small = dbl * (tr * 128 + 8 * tc) * 4 + 5 * tr * 128 * 4   # id rows/cols, out, scratch
        tmp = 6 * tr * tc * 4                                # logits/mask/p temporaries
        return in_b + small + tmp

    while vmem_est(TR, TC) > budget and TC > 128:
        TC = max(128, _round_up(TC // 2, 128))
    while vmem_est(TR, TC) > budget and TR > sub:
        TR = max(sub, _round_up(TR // 2, sub))

    vmem_limit = int(max(min(vmem_est(TR, TC) * 2, budget), 32 * 1024 * 1024))

    Np_r = _round_up(N, TR)
    Np_c = _round_up(N, TC)

    # ---- wrapper-side layout (skip pads that are no-ops) -----------------------------------
    def pad_to(a, rows, cols):
        r, c = a.shape
        if r == rows and c == cols:
            return a
        return jnp.pad(a, ((0, rows - r), (0, cols - c)))

    lhs_p = pad_to(jnp.concatenate([x1, x2], axis=0), Np_r, Dp)   # logits rows
    rhs_p = pad_to(jnp.concatenate([x2, x1], axis=0), Np_c, Dp)   # logits cols (stacked RHS)
    idr = jnp.pad(ids2, (0, Np_r - N), constant_values=-1).reshape(Np_r, 1)
    idc = jnp.pad(ids2, (0, Np_c - N), constant_values=-2).reshape(1, Np_c)

    kernel = functools.partial(
        _nce_kernel, inv_t=1.0 / float(temperature), n_valid=N, tr=TR, tc=TC)

    n_row_blocks = Np_r // TR
    cost = pl.CostEstimate(
        flops=2 * Np_r * Np_c * Dp,
        transcendentals=Np_r * Np_c,
        bytes_accessed=int(itemsize * (Np_r * Dp + n_row_blocks * Np_c * Dp)
                           + 4 * (2 * Np_r + Np_c)),
    )

    per_row = pl.pallas_call(
        kernel,
        out_shape=jax.ShapeDtypeStruct((Np_r, 1), jnp.float32),
        grid_spec=pltpu.PrefetchScalarGridSpec(
            num_scalar_prefetch=0,
            grid=(Np_r // TR, Np_c // TC),
            in_specs=[
                pl.BlockSpec((TR, Dp), lambda ri, ci: (ri, 0)),   # lhs rows
                pl.BlockSpec((TC, Dp), lambda ri, ci: (ci, 0)),   # rhs cols
                pl.BlockSpec((TR, 1), lambda ri, ci: (ri, 0)),    # row ids
                pl.BlockSpec((1, TC), lambda ri, ci: (0, ci)),    # col ids (lane-aligned)
            ],
            out_specs=pl.BlockSpec((TR, 1), lambda ri, ci: (ri, 0)),
            scratch_shapes=[
                pltpu.VMEM((TR, 1), jnp.float32),                 # running max
                pltpu.VMEM((TR, 1), jnp.float32),                 # running sum
                pltpu.VMEM((TR, 1), jnp.float32),                 # correct-class (diag) logit
            ],
        ),
        compiler_params=pltpu.CompilerParams(
            dimension_semantics=("parallel", "arbitrary"),
            vmem_limit_bytes=vmem_limit),
        cost_estimate=cost,
    )(lhs_p, rhs_p, idr, idc)

    # Final scalar reduction over the 2B real rows (padded rows discarded).
    return jnp.mean(per_row[:N, 0])


def _nce_loss_ref(x1, x2, intent_ids=None, *, temperature=1.0):
    """Pure-JAX reference mirroring the PyTorch module exactly."""
    with jax.default_matmul_precision("highest"):
        sim11 = (x1 @ x1.T) / temperature
        sim22 = (x2 @ x2.T) / temperature
        sim12 = (x1 @ x2.T) / temperature
    d = sim12.shape[-1]
    eye = jnp.eye(d, dtype=bool)
    if intent_ids is not None:
        ids = intent_ids.reshape(-1, 1)
        mask = ids == ids.T
        sim11 = jnp.where(mask, -jnp.inf, sim11)
        sim22 = jnp.where(mask, -jnp.inf, sim22)
        sim12 = jnp.where(mask & ~eye, -jnp.inf, sim12)
    else:
        sim11 = jnp.where(eye, -jnp.inf, sim11)
        sim22 = jnp.where(eye, -jnp.inf, sim22)
    raw1 = jnp.concatenate([sim12, sim11], axis=-1)
    raw2 = jnp.concatenate([sim22, sim12.T], axis=-1)
    logits = jnp.concatenate([raw1, raw2], axis=-2)
    labels = jnp.arange(2 * d)
    logp = logits - jax.scipy.special.logsumexp(logits, axis=-1, keepdims=True)
    return -jnp.mean(logp[jnp.arange(2 * d), labels])


if __name__ == "__main__":
    key = jax.random.PRNGKey(0)
    k1, k2, k3 = jax.random.split(key, 3)

    B, D = 8, 32
    temperature = 0.5  # deterministic "parameter" of the module

    x1 = jax.random.normal(k1, (B, D), dtype=jnp.float32)
    x2 = jax.random.normal(k2, (B, D), dtype=jnp.float32)
    intent_ids = jax.random.randint(k3, (B,), 0, 3, dtype=jnp.int32)

    # Path 1: intent_ids is None
    loss_none = jax.block_until_ready(nce_loss(x1, x2, None, temperature=temperature))
    ref_none = _nce_loss_ref(x1, x2, None, temperature=temperature)
    assert jnp.allclose(loss_none, ref_none, atol=1e-3, rtol=1e-3), (loss_none, ref_none)

    # Path 2: with intent_ids
    loss_ids = jax.block_until_ready(
        nce_loss(x1, x2, intent_ids, temperature=temperature))
    ref_ids = _nce_loss_ref(x1, x2, intent_ids, temperature=temperature)
    assert jnp.allclose(loss_ids, ref_ids, atol=1e-3, rtol=1e-3), (loss_ids, ref_ids)

    print("KERNEL_OK")
</pallas_src>

<mosaic_0001>
module attributes {stable_mosaic.version = 11 : i64} {
  func.func @_nce_kernel(%arg0: i32, %arg1: i32, %arg2: memref<8x128xf32, #tpu.memory_space<vmem>>, %arg3: memref<128x128xf32, #tpu.memory_space<vmem>>, %arg4: memref<8x1xi32, #tpu.memory_space<vmem>>, %arg5: memref<1x128xi32, #tpu.memory_space<vmem>>, %arg6: memref<8x1xf32, #tpu.memory_space<vmem>>, %arg7: memref<8x1xf32, #tpu.memory_space<vmem>>, %arg8: memref<8x1xf32, #tpu.memory_space<vmem>>, %arg9: memref<8x1xf32, #tpu.memory_space<vmem>>) attributes {dimension_semantics = [#tpu.dimension_semantics<parallel>, #tpu.dimension_semantics<arbitrary>], iteration_bounds = array<i64: 2, 1>, scalar_prefetch = 0 : i64, scratch_operands = 3 : i64, tpu.core_type = #tpu.core_type<tc>, window_params = [{transform_indices = @transform_0, window_bounds = array<i64: 8, 128>}, {transform_indices = @transform_1, window_bounds = array<i64: 128, 128>}, {transform_indices = @transform_2, window_bounds = array<i64: 8, 1>}, {transform_indices = @transform_3, window_bounds = array<i64: 1, 128>}, {transform_indices = @transform_4, window_bounds = array<i64: 8, 1>}]} {
    %c0_i32 = arith.constant 0 : i32
    %0 = arith.cmpi eq, %arg1, %c0_i32 : i32
    %1 = arith.extui %0 : i1 to i32
    %c0_i32_0 = arith.constant 0 : i32
    %2 = arith.cmpi ne, %1, %c0_i32_0 : i32
    scf.if %2 {
      %cst_28 = arith.constant -1.000000e+30 : f32
      %61 = vector.broadcast %cst_28 : f32 to vector<8x1xf32>
      %c0_29 = arith.constant 0 : index
      %c0_30 = arith.constant 0 : index
      %62 = vector.load %arg7[%c0_29, %c0_30] : memref<8x1xf32, #tpu.memory_space<vmem>>, vector<8x1xf32>
      tpu.vector_store %arg7[%c0_29, %c0_30], %61 {strides = array<i32>} : memref<8x1xf32, #tpu.memory_space<vmem>>, vector<8x1xf32>,
      %cst_31 = arith.constant 0.000000e+00 : f32
      %63 = vector.broadcast %cst_31 : f32 to vector<8x1xf32>
      %c0_32 = arith.constant 0 : index
      %c0_33 = arith.constant 0 : index
      %64 = vector.load %arg8[%c0_32, %c0_33] : memref<8x1xf32, #tpu.memory_space<vmem>>, vector<8x1xf32>
      tpu.vector_store %arg8[%c0_32, %c0_33], %63 {strides = array<i32>} : memref<8x1xf32, #tpu.memory_space<vmem>>, vector<8x1xf32>,
      %cst_34 = arith.constant 0.000000e+00 : f32
      %65 = vector.broadcast %cst_34 : f32 to vector<8x1xf32>
      %c0_35 = arith.constant 0 : index
      %c0_36 = arith.constant 0 : index
      %66 = vector.load %arg9[%c0_35, %c0_36] : memref<8x1xf32, #tpu.memory_space<vmem>>, vector<8x1xf32>
      tpu.vector_store %arg9[%c0_35, %c0_36], %65 {strides = array<i32>} : memref<8x1xf32, #tpu.memory_space<vmem>>, vector<8x1xf32>,
    } else {
    }
    %c0 = arith.constant 0 : index
    %c0_1 = arith.constant 0 : index
    %3 = vector.load %arg2[%c0, %c0_1] : memref<8x128xf32, #tpu.memory_space<vmem>>, vector<8x128xf32>
    %c0_2 = arith.constant 0 : index
    %c0_3 = arith.constant 0 : index
    %4 = vector.load %arg3[%c0_2, %c0_3] : memref<128x128xf32, #tpu.memory_space<vmem>>, vector<128x128xf32>
    %cst = arith.constant dense<0.000000e+00> : vector<8x128xf32>
    %5 = tpu.matmul %3, %4, %cst {dimension_numbers = #tpu.dot_dimension_numbers<[1], [1], [0], [0], [0, 0, 1, 0], [], []>} : vector<8x128xf32>, vector<128x128xf32>, vector<8x128xf32> -> vector<8x128xf32>
    %cst_4 = arith.constant 2.000000e+00 : f32
    %6 = vector.broadcast %cst_4 : f32 to vector<8x128xf32>
    %7 = arith.mulf %5, %6 : vector<8x128xf32>
    %c8_i32 = arith.constant 8 : i32
    %8 = arith.muli %arg0, %c8_i32 : i32
    %9 = tpu.iota {dimensions = array<i32: 0>} : vector<8x1xi32>
    %10 = vector.broadcast %8 : i32 to vector<8x1xi32>
    %11 = arith.addi %10, %9 : vector<8x1xi32>
    %c128_i32 = arith.constant 128 : i32
    %12 = arith.muli %arg1, %c128_i32 : i32
    %13 = tpu.iota {dimensions = array<i32: 1>} : vector<1x128xi32>
    %14 = vector.broadcast %12 : i32 to vector<1x128xi32>
    %15 = arith.addi %14, %13 : vector<1x128xi32>
    %c0_5 = arith.constant 0 : index
    %c0_6 = arith.constant 0 : index
    %16 = vector.load %arg4[%c0_5, %c0_6] : memref<8x1xi32, #tpu.memory_space<vmem>>, vector<8x1xi32>
    %c0_7 = arith.constant 0 : index
    %c0_8 = arith.constant 0 : index
    %17 = vector.load %arg5[%c0_7, %c0_8] : memref<1x128xi32, #tpu.memory_space<vmem>>, vector<1x128xi32>
    %18 = vector.broadcast %16 : vector<8x1xi32> to vector<8x128xi32>
    %19 = vector.broadcast %17 : vector<1x128xi32> to vector<8x128xi32>
    %20 = arith.cmpi eq, %18, %19 : vector<8x128xi32>
    %21 = vector.broadcast %11 : vector<8x1xi32> to vector<8x128xi32>
    %22 = vector.broadcast %15 : vector<1x128xi32> to vector<8x128xi32>
    %23 = arith.cmpi ne, %21, %22 : vector<8x128xi32>
    %c16_i32 = arith.constant 16 : i32
    %24 = vector.broadcast %c16_i32 : i32 to vector<1x128xi32>
    %25 = arith.cmpi sge, %15, %24 : vector<1x128xi32>
    %26 = arith.andi %20, %23 : vector<8x128xi1>
    %27 = vector.broadcast %25 : vector<1x128xi1> to vector<8x128xi1>
    %28 = arith.ori %26, %27 : vector<8x128xi1>
    %cst_9 = arith.constant -1.000000e+30 : f32
    %29 = vector.broadcast %cst_9 : f32 to vector<8x128xf32>
    %30 = arith.select %28, %29, %7 : vector<8x128xi1>, vector<8x128xf32>
    %c8_i32_10 = arith.constant 8 : i32
    %31 = arith.muli %arg0, %c8_i32_10 : i32
    %c128_i32_11 = arith.constant 128 : i32
    %32 = arith.muli %arg1, %c128_i32_11 : i32
    %c128_i32_12 = arith.constant 128 : i32
    %33 = arith.addi %32, %c128_i32_12 : i32
    %34 = arith.cmpi slt, %31, %33 : i32
    %c8_i32_13 = arith.constant 8 : i32
    %35 = arith.addi %31, %c8_i32_13 : i32
    %36 = arith.cmpi sgt, %35, %32 : i32
    %37 = arith.andi %34, %36 : i1
    %38 = arith.extui %37 : i1 to i32
    %c0_i32_14 = arith.constant 0 : i32
    %39 = arith.cmpi ne, %38, %c0_i32_14 : i32
    scf.if %39 {
      %c0_28 = arith.constant 0 : index
      %c0_29 = arith.constant 0 : index
      %61 = vector.load %arg9[%c0_28, %c0_29] : memref<8x1xf32, #tpu.memory_space<vmem>>, vector<8x1xf32>
      %62 = vector.broadcast %11 : vector<8x1xi32> to vector<8x128xi32>
      %63 = vector.broadcast %15 : vector<1x128xi32> to vector<8x128xi32>
      %64 = arith.cmpi eq, %62, %63 : vector<8x128xi32>
      %cst_30 = arith.constant 0.000000e+00 : f32
      %65 = vector.broadcast %cst_30 : f32 to vector<8x128xf32>
      %66 = arith.select %64, %7, %65 : vector<8x128xi1>, vector<8x128xf32>
      %cst_31 = arith.constant dense<0.000000e+00> : vector<8xf32>
      %67 = vector.multi_reduction <add>, %66, %cst_31 [1] : vector<8x128xf32> to vector<8xf32>
      %68 = vector.shape_cast %67 : vector<8xf32> to vector<8x1xf32>
      %69 = arith.addf %61, %68 : vector<8x1xf32>
      %c0_32 = arith.constant 0 : index
      %c0_33 = arith.constant 0 : index
      %70 = vector.load %arg9[%c0_32, %c0_33] : memref<8x1xf32, #tpu.memory_space<vmem>>, vector<8x1xf32>
      tpu.vector_store %arg9[%c0_32, %c0_33], %69 {strides = array<i32>} : memref<8x1xf32, #tpu.memory_space<vmem>>, vector<8x1xf32>,
    } else {
    }
    %c0_15 = arith.constant 0 : index
    %c0_16 = arith.constant 0 : index
    %40 = vector.load %arg7[%c0_15, %c0_16] : memref<8x1xf32, #tpu.memory_space<vmem>>, vector<8x1xf32>
    %cst_17 = arith.constant dense<0xFF800000> : vector<8xf32>
    %41 = vector.multi_reduction <maximumf>, %30, %cst_17 [1] : vector<8x128xf32> to vector<8xf32>
    %42 = vector.shape_cast %41 : vector<8xf32> to vector<8x1xf32>
    %43 = arith.maximumf %40, %42 : vector<8x1xf32>
    %44 = vector.broadcast %43 : vector<8x1xf32> to vector<8x128xf32>
    %45 = arith.subf %30, %44 : vector<8x128xf32>
    %46 = math.exp %45 : vector<8x128xf32>
    %cst_18 = arith.constant 0.000000e+00 : f32
    %47 = vector.broadcast %cst_18 : f32 to vector<8x128xf32>
    %48 = arith.select %28, %47, %46 : vector<8x128xi1>, vector<8x128xf32>
    %c0_19 = arith.constant 0 : index
    %c0_20 = arith.constant 0 : index
    %49 = vector.load %arg8[%c0_19, %c0_20] : memref<8x1xf32, #tpu.memory_space<vmem>>, vector<8x1xf32>
    %50 = arith.subf %40, %43 : vector<8x1xf32>
    %51 = math.exp %50 : vector<8x1xf32>
    %52 = arith.mulf %49, %51 : vector<8x1xf32>
    %cst_21 = arith.constant dense<0.000000e+00> : vector<8xf32>
    %53 = vector.multi_reduction <add>, %48, %cst_21 [1] : vector<8x128xf32> to vector<8xf32>
    %54 = vector.shape_cast %53 : vector<8xf32> to vector<8x1xf32>
    %55 = arith.addf %52, %54 : vector<8x1xf32>
    %c0_22 = arith.constant 0 : index
    %c0_23 = arith.constant 0 : index
    %56 = vector.load %arg8[%c0_22, %c0_23] : memref<8x1xf32, #tpu.memory_space<vmem>>, vector<8x1xf32>
    tpu.vector_store %arg8[%c0_22, %c0_23], %55 {strides = array<i32>} : memref<8x1xf32, #tpu.memory_space<vmem>>, vector<8x1xf32>,
    %c0_24 = arith.constant 0 : index
    %c0_25 = arith.constant 0 : index
    %57 = vector.load %arg7[%c0_24, %c0_25] : memref<8x1xf32, #tpu.memory_space<vmem>>, vector<8x1xf32>
    tpu.vector_store %arg7[%c0_24, %c0_25], %43 {strides = array<i32>} : memref<8x1xf32, #tpu.memory_space<vmem>>, vector<8x1xf32>,
    %c0_i32_26 = arith.constant 0 : i32
    %58 = arith.cmpi eq, %arg1, %c0_i32_26 : i32
    %59 = arith.extui %58 : i1 to i32
    %c0_i32_27 = arith.constant 0 : i32
    %60 = arith.cmpi ne, %59, %c0_i32_27 : i32
    scf.if %60 {
      %c0_28 = arith.constant 0 : index
      %c0_29 = arith.constant 0 : index
      %61 = vector.load %arg7[%c0_28, %c0_29] : memref<8x1xf32, #tpu.memory_space<vmem>>, vector<8x1xf32>
      %c0_30 = arith.constant 0 : index
      %c0_31 = arith.constant 0 : index
      %62 = vector.load %arg8[%c0_30, %c0_31] : memref<8x1xf32, #tpu.memory_space<vmem>>, vector<8x1xf32>
      %63 = math.log %62 : vector<8x1xf32>
      %64 = arith.addf %61, %63 : vector<8x1xf32>
      %c0_32 = arith.constant 0 : index
      %c0_33 = arith.constant 0 : index
      %65 = vector.load %arg9[%c0_32, %c0_33] : memref<8x1xf32, #tpu.memory_space<vmem>>, vector<8x1xf32>
      %66 = arith.subf %64, %65 : vector<8x1xf32>
      %c0_34 = arith.constant 0 : index
      %c0_35 = arith.constant 0 : index
      %67 = vector.load %arg6[%c0_34, %c0_35] : memref<8x1xf32, #tpu.memory_space<vmem>>, vector<8x1xf32>
      tpu.vector_store %arg6[%c0_34, %c0_35], %66 {strides = array<i32>} : memref<8x1xf32, #tpu.memory_space<vmem>>, vector<8x1xf32>,
    } else {
    }
    return
  }
  func.func @transform_0(%arg0: i32, %arg1: i32) -> (i32, i32) {
    %c0_i32 = arith.constant 0 : i32
    %c0_i32_0 = arith.constant 0 : i32
    return %arg0, %c0_i32 : i32, i32
  }
  func.func @transform_1(%arg0: i32, %arg1: i32) -> (i32, i32) {
    %c0_i32 = arith.constant 0 : i32
    %c0_i32_0 = arith.constant 0 : i32
    return %arg1, %c0_i32 : i32, i32
  }
  func.func @transform_2(%arg0: i32, %arg1: i32) -> (i32, i32) {
    %c0_i32 = arith.constant 0 : i32
    %c0_i32_0 = arith.constant 0 : i32
    return %arg0, %c0_i32 : i32, i32
  }
  func.func @transform_3(%arg0: i32, %arg1: i32) -> (i32, i32) {
    %c0_i32 = arith.constant 0 : i32
    %c0_i32_0 = arith.constant 0 : i32
    return %c0_i32, %arg1 : i32, i32
  }
  func.func @transform_4(%arg0: i32, %arg1: i32) -> (i32, i32) {
    %c0_i32 = arith.constant 0 : i32
    %c0_i32_0 = arith.constant 0 : i32
    return %arg0, %c0_i32 : i32, i32
  }
}

</mosaic_0001>

<bundles_post_ra>
// kernel: tpu_custom_call.1
= control target key start
LH: loop header
LB: loop body
LE: loop exit
PB: predicated region body
PF: predicated region fallthrough
CT: control target
= control target key end

     0   :  { %9 = vsyncpa [#allocation6], 0  ;;  %s635_s15 = smov 0   ;;  %s637_s16 = smov 0   ;;  %s719_s0 = inlined_call_operand.vmem [shape: f32[16,128], index: 0, kind: input, shape index: {}]   ;;  %s720_s1 = inlined_call_operand.hbm [shape: f32[128,128], index: 1, kind: input, shape index: {}]   ;;  %s721_s2 = inlined_call_operand.vmem [shape: s32[16,1], index: 2, kind: input, shape index: {}]   ;;  %s722_s3 = inlined_call_operand.vmem [shape: s32[1,128], index: 3, kind: input, shape index: {}]   ;;  %s723_s4 = inlined_call_operand.vmem [shape: f32[16,1], index: 4, kind: output, shape index: {}]  }
   0x1   :  { %s639_s17 = smov 0  }
   0x2 LB: > { %s483_s18 = sadd.s32 4294967295, %s602_s17   ;;  %s27_s19 = sadd.s32 1, %s598_s16  ;;  %s602_s17 = sphi %s639_s17, %s15_s17   ;;  %s598_s16 = sphi %s637_s16, %s728_s16   ;;  %s594_s15 = sphi %s635_s15, %s727_s15  }
   0x3   : > { %p29_p0 = scmp.ge.s32.totalorder %s27_s19, 2  ;;  %p485_p1 = scmp.ge.s32.totalorder %s602_s17, 1 }
   0x4   : > { %p162_p2 = scmp.lt.s32.totalorder %s602_s17, 3  ;;  %p505_p4 = scmp.eq.s32.totalorder %s483_s18, 0 }
   0x5   : > { %s730_s19 = smov (%p29_p0, %s27_s19), 0  ;;  %s176_s22 = sshll.u32 %s720_s1, 4  ;;  %s177_s22 = int_to_ptr.hbm [resolvable:$true] %s176_s22 }
   0x6   : > { %p163_p3 = pnand %p485_p1, %p162_p2  ;;  %s604_s23 = smov [#allocation5]  }
   0x7   : > { %s178_s24 = sshll.u32 %s604_s23, 4  ;;  %s605_s25 = smov 128   ;;  %s179_s24 = int_to_ptr.vmem [resolvable:$true] %s178_s24 }
   0x8   : > { %p501_p5 = pneg %p163_p3  ;;  %s606_s26 = smov 8  }
   0x9   : > { %214 = sbr.rel (%p163_p3) target bundleno = 715 (0x2cb), region = 36 }
   0xa   : > { %p502_p6 = pnand %p505_p4, %p501_p5 }
   0xc   : > { %504 = dma.hbm_to_vmem [thread:$0]  (!%p502_p6), %s177_s22, 2048, %s179_s24, [#allocation6], %s605_s25, %s605_s25, %s606_s26  }
   0xe   : > { %589 = dma.done.wait (%p505_p4), [#allocation6], 2048  }
   0xf   : > { %591 = vsyncadd (%p505_p4), [#allocation6], 4294965248  ;;  %vm266_vm0 = vcmask 7168   ;;  %v607_v0 = vmov -1e+30   ;;  %p246_p7 = scmp.lt.s32.totalorder %s594_s15, 1  ;;  %v309_v21 = vlaneseq }
  0x10   : > { %267 = vst.msk [vmem:[#allocation2] sm:$0xff] %vm266_vm0, %v607_v0  ;;  %s662_s27 = sshll.u32 %s594_s15, 3  ;;  %v608_v1 = vmov 0.0   ;;  %v286_v2 = vld [vmem:[#allocation5 + $0x78] sm:$0xff]  ;;  %v285_v3 = vld [vmem:[#allocation5 + $0x70] sm:$0xff]  ;;  %v284_v4 = vld [vmem:[#allocation5 + $0x68] sm:$0xff] }
  0x11   : > { %268 = vst.msk [vmem:[#allocation3] sm:$0xff] %vm266_vm0, %v608_v1  ;;  %p333_p8 = scmp.lt.s32.totalorder %s662_s27, 128  ;;  %s334_s28 = sadd.s32 8, %s662_s27  ;;  %287 = vmatpush.xpose.msra.mxu0 %v286_v2  ;;  %v283_v5 = vld [vmem:[#allocation5 + $0x60] sm:$0xff]  ;;  %v282_v6 = vld [vmem:[#allocation5 + $0x58] sm:$0xff]  ;;  %v281_v7 = vld [vmem:[#allocation5 + $0x50] sm:$0xff]  ;;  %v311_v23 = vstv %s662_s27 }
  0x12   : > { %269 = vst.msk [vmem:[#allocation4] sm:$0xff] %vm266_vm0, %v608_v1  ;;  %s732_s15 = smov (!%p246_p7, %s594_s15), 1  ;;  %p335_p9 = scmp.gt.s32.totalorder %s334_s28, 0  ;;  %v280_v8 = vld [vmem:[#allocation5 + $0x48] sm:$0xff]  ;;  %v279_v9 = vld [vmem:[#allocation5 + $0x40] sm:$0xff]  ;;  %v278_v10 = vld [vmem:[#allocation5 + $0x38] sm:$0xff] }
  0x13   : > { %s669_s29 = sshll.u32 %s732_s15, 3  ;;  %v609_v12 = vmov 0   ;;  %v277_v13 = vld [vmem:[#allocation5 + $0x30] sm:$0xff]  ;;  %v276_v14 = vld [vmem:[#allocation5 + $0x28] sm:$0xff]  ;;  %v275_v15 = vld [vmem:[#allocation5 + $0x20] sm:$0xff]  ;;  %v310_v22 = vshrl.u32 %v309_v21, 7 }
  0x14   : > { %s261_s6 = scalar_lea.vmem %s723_s4, %s669_s29  ;;  %p675_p10 = pnand %p335_p9, %p333_p8  ;;  %537 = vset.pattern.permute.xlu0 %v609_v12  ;;  %v274_v16 = vld [vmem:[#allocation5 + $0x18] sm:$0xff]  ;;  %v273_v17 = vld [vmem:[#allocation5 + $0x10] sm:$0xff]  ;;  %v272_v18 = vld [vmem:[#allocation5 + $0x8] sm:$0xff]  ;;  %v315_v25 = vand.u32 127, %v309_v21 }
  0x15   : > { %288 = vmatpush.xpose.msra.mxu0 %v285_v3  ;;  %s254_s10 = scalar_lea.vmem %s721_s2, %s669_s29  ;;  %v271_v19 = vld [vmem:[#allocation5] sm:$0xff]  ;;  %s249_s13 = scalar_lea.vmem %s719_s0, %s669_s29  ;;  %v312_v24 = vadd.s32 %v311_v23, %v310_v22  ;;  %v538_v26 = vld [vmem:[%s722_s3] ss:$0 sm:$0xff] }
  0x16   : > { %v318_v11 = vld [vmem:[%s254_s10] sm:$0xff]  ;;  %vm326_vm3 = vcmp.ge.s32.totalorder %v315_v25, 16 }
  0x17   : > { %321 = vperm.xlu0 %537, %v318_v11   ;;  %v270_v20 = vld [vmem:[%s249_s13] sm:$0xff]  ;;  %vm325_vm1 = vcmp.ne.s32.totalorder %v312_v24, %v315_v25 }
  0x19   : > { %289 = vmatpush.xpose.msra.mxu0 %v284_v4 }
  0x1d   : > { %290 = vmatpush.xpose.msra.mxu0 %v283_v5 }
  0x21   : > { %291 = vmatpush.xpose.msra.mxu0 %v282_v6 }
  0x25   : > { %292 = vmatpush.xpose.msra.mxu0 %v281_v7 }
  0x29   : > { %293 = vmatpush.xpose.msra.mxu0 %v280_v8 }
  0x2d   : > { %294 = vmatpush.xpose.msra.mxu0 %v279_v9 }
  0x31   : > { %295 = vmatpush.xpose.msra.mxu0 %v278_v10 }
  0x35   : > { %296 = vmatpush.xpose.msra.mxu0 %v277_v13 }
  0x39   : > { %297 = vmatpush.xpose.msra.mxu0 %v276_v14 }
  0x3d   : > { %298 = vmatpush.xpose.msra.mxu0 %v275_v15 }
  0x41   : > { %299 = vmatpush.xpose.msra.mxu0 %v274_v16 }
  0x45   : > { %300 = vmatpush.xpose.msra.mxu0 %v273_v17 }
  0x49   : > { %301 = vmatpush.xpose.msra.mxu0 %v272_v18 }
  0x4d   : > { %302 = vmatpush.xpose.msra.mxu0 %v271_v19 }
  0x50   : > { %303 = vmatmul.f32.vlgmr.msra.gmra.mxu0 %v270_v20 }
  0x89   : > { %v322_v27 = vpop.permute.xlu0 %321 }
  0x8a   : > { %vm324_vm2 = vcmp.eq.s32.totalorder %v322_v27, %v538_v26 }
  0x8b   : > { %vm327_vm4 = vmand %vm324_vm2, %vm325_vm1 }
  0x8c   : > { %vm691_vm5 = vmor %vm327_vm4, %vm326_vm3 }
  0xcc   : > { %339 = sbr.rel (%p675_p10) target bundleno = 330 (0x14a), region = 48 }
  0xcd   : > { %v304_v29 = vpop.f32.mrf.mxu0 }
  0xce   : > { %v307_v30 = vmul.f32 2.0, %v304_v29 }
  0xd0   : > { %v331_v31 = vsel %vm691_vm5, -1e+30, %v307_v30 }
  0xd1   : > { %vm341_vm6 = vcmp.eq.s32.totalorder %v312_v24, %v315_v25  ;;  %v340_v33 = vld [vmem:[#allocation4] sm:$0xff] }
  0xd2   : > { %v342_v32 = vsel %vm341_vm6, %v307_v30, 0.0 }
  0xd3   : > { %343 = vadd.xlane.f32.xlu0 %v342_v32 }
 0x146   : > { %v344_v34 = vpop.xlane.xlu0 %343 }
 0x147   : > { %v345_v35 = vadd.f32 %v344_v34, %v340_v33 }
 0x149   : > { %347 = vst.msk [vmem:[#allocation4] sm:$0xff] %vm266_vm0, %v345_v35 }
 0x14a PF: > { %349 = vmax.xlane.f32.xlu0 %v331_v31  ;;  %v348_v36 = vld [vmem:[#allocation2] sm:$0xff]  ;;  %v361_v47 = vld [vmem:[#allocation3] sm:$0xff] }
 0x14b   : > { %539 = vset.pattern.permute.xlu0 %v609_v12 }
 0x150   : > { %v380_v55 = vld [vmem:[#allocation4] sm:$0xff] }
 0x1bd   : > { %v350_v37 = vpop.xlane.xlu0 %349 }
 0x1be   : > { %v351_v38 = vmax.f32 %v348_v36, %v350_v37 }
 0x1c0   : > { %v362_v39 = vsub.f32 %v348_v36, %v351_v38  ;;  %371 = vst.msk [vmem:[#allocation2] sm:$0xff] %vm266_vm0, %v351_v38  ;;  %354 = vperm.xlu0 %539, %v351_v38  }
 0x1c2   : > { %v363_v45 = vmul.f32 1.442695, %v362_v39 }
 0x1c7   : > { %v375_v54 = vld [vmem:[#allocation2] sm:$0xff] }
 0x232   : > { %v355_v40 = vpop.permute.xlu0 %354 }
 0x233   : > { %v357_v41 = vsub.f32 %v331_v31, %v355_v40 }
 0x235   : > { %v358_v42 = vmul.f32 1.442695, %v357_v41 }
 0x237   : > { %540 = vpow2.f32 %v358_v42 }
 0x238   : > { %542 = vpow2.f32 %v363_v45 }
 0x23d   : > { %v541_v43 = vpop.eup %540 }
 0x23e   : > { %v360_v44 = vsel %vm691_vm5, 0.0, %v541_v43  ;;  %v543_v46 = vpop.eup %542 }
 0x23f   : > { %366 = vadd.xlane.f32.xlu1 %v360_v44  ;;  %v365_v48 = vmul.f32 %v543_v46, %v361_v47 }
 0x2b2   : > { %v367_v49 = vpop.xlane.xlu1 %366 }
 0x2b3   : > { %v368_v50 = vadd.f32 %v367_v49, %v365_v48 }
 0x2b5   : > { %370 = vst.msk [vmem:[#allocation3] sm:$0xff] %vm266_vm0, %v368_v50 }
 0x2bc   : > { %v376_v51 = vld [vmem:[#allocation3] sm:$0xff] }
 0x2bd   : > { %544 = vlog2.f32 %v376_v51 }
 0x2c3   : > { %v545_v52 = vpop.eup %544 }
 0x2c4   : > { %v378_v53 = vmul.f32 0.6931472, %v545_v52 }
 0x2c6   : > { %v379_v56 = vadd.f32 %v378_v53, %v375_v54 }
 0x2c8   : > { %v381_v57 = vsub.f32 %v379_v56, %v380_v55 }
 0x2ca   : > { %382 = vst.msk [vmem:[%s261_s6] sm:$0xff] %vm266_vm0, %v381_v57 }
 0x2cb PF: > { %s15_s17 = sadd.s32 1, %s602_s17   ;;  %s727_s15 = smov %s598_s16 }
 0x2cc   : > { %p12_p11 = scmp.ge.s32.totalorder %s15_s17, 4   ;;  %s728_s16 = smov %s730_s19 }
 0x2ce   :  { %14 = sbr.rel (!%p12_p11) target bundleno = 2 (0x2), region = 90 }
 0x2d3   :  { %402 = vsyncpa [#allocation6], 1 }
 0x2d4   :  { %404 = vsyncpa [#allocation6 + $0x1], 1 }

</bundles_post_ra>
